<compile_context>
chip_gen: v7x
topology: tpu7x:2x2x1
jax: 0.10.0
libtpu: 0.0.40
codegen_flags: <defaults>
</compile_context>

<pallas_src>
import math
import jax
import jax.numpy as jnp
from jax.experimental import pallas as pl
from jax.experimental.pallas import tpu as pltpu

_MB = 1024 * 1024


def _detect_tpu_generation():
    try:
        kind = jax.devices()[0].device_kind.lower()
    except Exception:
        return "unknown"
    if "v5" in kind:
        return "v5e"
    if "v6" in kind:
        return "v6e"
    if "v7" in kind:
        return "v7x"
    return "unknown"


def _weight_block_spec(block_shape, index_map):
    """BlockSpec for operands whose block index is constant along the inner
    (BT) grid axis: single-buffer them to save VMEM headroom."""
    if hasattr(pl, "Buffered"):
        try:
            return pl.BlockSpec(block_shape, index_map, pipeline_mode=pl.Buffered(1))
        except TypeError:
            pass
    return pl.BlockSpec(block_shape, index_map)


def _lora_cattn_kernel(x_ref, w_ref, bias_ref, at_ref, bveff_ref, o_ref):
    # x_ref:     (TM, C)     activation tile, f32 (cast to compute dtype in-kernel)
    # w_ref:     (C, TN)     base weight tile (compute dtype)
    # bias_ref:  (1, TN)     f32 bias slice
    # at_ref:    (C, rank)   A^T (compute dtype), fully resident
    # bveff_ref: (rank, TN)  (alpha * scale) pre-folded into B (compute dtype)
    # o_ref:     (TM, TN)    output tile
    x = x_ref[...].astype(w_ref.dtype)          # free VPU cast under the MXU

    # Small LoRA term + bias first, then accumulate the big base matmul into it
    # (avoids holding two full-tile f32 temporaries simultaneously).
    s = jnp.dot(x, at_ref[...], preferred_element_type=jnp.float32)      # (TM, rank)
    acc = jnp.dot(s.astype(bveff_ref.dtype), bveff_ref[...],
                  preferred_element_type=jnp.float32)                    # (TM, TN)
    acc = acc + bias_ref[...]
    acc = acc + jnp.dot(x, w_ref[...], preferred_element_type=jnp.float32)
    o_ref[...] = acc.astype(o_ref.dtype)


def _addmm_kernel(x_ref, w_ref, bias_ref, o_ref):
    # Folded-LoRA path: out = x @ W_eff + bias (single matmul, used on v5e).
    x = x_ref[...].astype(w_ref.dtype)
    acc = jnp.dot(x, w_ref[...], preferred_element_type=jnp.float32)
    o_ref[...] = (acc + bias_ref[...]).astype(o_ref.dtype)


def dynamic_lora_c_attn(x, base_weight, base_bias, a_vectors, b_vectors, alpha,
                        *, compute_dtype=jnp.bfloat16, out_dtype=None,
                        tm=None, tn=None, fold_lora=None, vmem_limit_bytes=None):
    """Pallas implementation of DynamicLoRACAttn.forward.

    x:             (B, T, C) float32
    base_weight:   (in_dim, out_dim) or (out_dim, in_dim)  (transpose auto-detected
                   exactly like the PyTorch module)
    base_bias:     (out_dim,)
    a_vectors:     (rank, in_dim)
    b_vectors:     (rank, out_dim)
    alpha:         (rank,)
    compute_dtype: matmul-operand dtype (bf16 default = MXU fast path; accumulation
                   stays f32; bias stays f32).
    out_dtype:     output dtype (default x.dtype). bf16 output halves writeback
                   bytes if downstream attention accepts bf16 QKV.
    tm, tn:        tile sizes (None -> generation-aware defaults; tn defaults to
                   full out_dim so x is streamed exactly once).
    fold_lora:     fold the LoRA update into W once in the wrapper and run a
                   single matmul (None -> auto: True on v5e, False elsewhere).
    returns:       (B, T, out_dim) in out_dtype.
    """
    B, T, C = x.shape
    out_dtype = x.dtype if out_dtype is None else out_dtype

    # Mirror the module's transpose auto-detection (GPT-2 Conv1D: (in_dim, out_dim)).
    ws = base_weight.shape
    if ws[0] > ws[1]:
        out_dim, in_dim = ws
        base_weight = base_weight.T
    else:
        in_dim, out_dim = ws
    assert C == in_dim, f"feature dim mismatch: x has {C}, weight expects {in_dim}"

    rank = a_vectors.shape[0]
    scale = 1.0 / math.sqrt(rank)
    BT = B * T

    # Generation-aware defaults.
    gen = _detect_tpu_generation()
    if tm is None:
        tm = 1024 if gen in ("v5e", "v6e") else 512
    if tn is None:
        tn = out_dim                          # full width: stream x exactly once
    if vmem_limit_bytes is None:
        vmem_limit_bytes = 96 * _MB if gen in ("v5e", "v6e") else 48 * _MB
    if fold_lora is None:
        fold_lora = (gen == "v5e")            # MXU-bound there; HBM-bound on v6e/v7x

    TM = BT if BT <= tm else tm
    TN = out_dim if out_dim <= tn else tn

    # Wrapper glue (plain JAX, runs once / outside the hot loop).
    x_2d = x.reshape(BT, C)                                           # keep f32 in HBM
    bias_2d = base_bias.reshape(1, out_dim).astype(jnp.float32)
    bv_eff_f32 = (alpha * scale)[:, None] * b_vectors                 # (rank, out_dim)

    # Grid: out_dim blocks OUTER (size 1 at full TN), BT blocks INNER, so the
    # weight-side tiles keep a constant block index across the inner axis and the
    # BT axis is the one megacore-sharded.
    grid = (pl.cdiv(out_dim, TN), pl.cdiv(BT, TM))

    compiler_params = pltpu.CompilerParams(
        dimension_semantics=("parallel", "parallel"),
        vmem_limit_bytes=vmem_limit_bytes,
    )

    x_spec = pl.BlockSpec((TM, C), lambda j, i: (i, 0))               # streams over BT
    out_spec = pl.BlockSpec((TM, TN), lambda j, i: (i, j))

    if fold_lora:
        # W_eff = W + A^T @ (diag(alpha*scale) @ B), folded once in f32.
        w_eff = (base_weight.astype(jnp.float32)
                 + a_vectors.T.astype(jnp.float32) @ bv_eff_f32).astype(compute_dtype)
        out_2d = pl.pallas_call(
            _addmm_kernel,
            out_shape=jax.ShapeDtypeStruct((BT, out_dim), out_dtype),
            grid=grid,
            in_specs=[
                x_spec,
                _weight_block_spec((C, TN), lambda j, i: (0, j)),
                _weight_block_spec((1, TN), lambda j, i: (0, j)),
            ],
            out_specs=out_spec,
            compiler_params=compiler_params,
        )(x_2d, w_eff, bias_2d)
    else:
        w = base_weight.astype(compute_dtype)
        a_t = a_vectors.T.astype(compute_dtype)                       # (C, rank)
        bv_eff = bv_eff_f32.astype(compute_dtype)                     # (rank, out_dim)
        out_2d = pl.pallas_call(
            _lora_cattn_kernel,
            out_shape=jax.ShapeDtypeStruct((BT, out_dim), out_dtype),
            grid=grid,
            in_specs=[
                x_spec,
                _weight_block_spec((C, TN), lambda j, i: (0, j)),      # W
                _weight_block_spec((1, TN), lambda j, i: (0, j)),      # bias
                _weight_block_spec((C, rank), lambda j, i: (0, 0)),    # A^T
                _weight_block_spec((rank, TN), lambda j, i: (0, j)),   # (alpha*scale)*B
            ],
            out_specs=out_spec,
            compiler_params=compiler_params,
        )(x_2d, w, bias_2d, a_t, bv_eff)

    return out_2d.reshape(B, T, out_dim)


def dynamic_lora_c_attn_ref(x, base_weight, base_bias, a_vectors, b_vectors, alpha):
    """Pure-JAX reference matching the PyTorch forward exactly."""
    B, T, C = x.shape
    rank = a_vectors.shape[0]
    scale = 1.0 / math.sqrt(rank)
    ws = base_weight.shape
    w = base_weight.T if ws[0] > ws[1] else base_weight
    out_dim = w.shape[1]
    x_2d = x.reshape(B * T, C)
    base_2d = base_bias[None, :] + x_2d @ w
    s = x_2d @ a_vectors.T                                            # (BT, rank)
    lora_2d = (s[:, :, None] * b_vectors[None, :, :]
               * alpha[None, :, None] * scale).sum(axis=1)            # (BT, out_dim)
    return (base_2d + lora_2d).reshape(B, T, out_dim)


if __name__ == "__main__":
    # Small shapes consistent with the module: hidden=32 (real GPT-2 would be 768),
    # out_dim = 3*hidden = 96 (qkv), batch=2, seq=8, rank=8.
    B, T, C = 2, 8, 32
    out_dim = 3 * C
    rank = 8

    key = jax.random.PRNGKey(0)
    k_x, k_w, k_b, k_a, k_bv = jax.random.split(key, 5)

    x = jax.random.normal(k_x, (B, T, C), dtype=jnp.float32)
    # GPT-2 Conv1D stores weight as (in_dim, out_dim) -> transpose_needed=False.
    base_weight = jax.random.normal(k_w, (C, out_dim), dtype=jnp.float32) * 0.02
    base_bias = jax.random.normal(k_b, (out_dim,), dtype=jnp.float32) * 0.02
    a_vectors = jax.random.normal(k_a, (rank, C), dtype=jnp.float32) * 0.01
    b_vectors = jax.random.normal(k_bv, (rank, out_dim), dtype=jnp.float32) * 0.01
    alpha = jnp.ones((rank,), dtype=jnp.float32) * 0.1

    ref = dynamic_lora_c_attn_ref(x, base_weight, base_bias, a_vectors, b_vectors, alpha)

    # f32-operand, in-kernel-LoRA path: exact (up to reassociation) vs reference.
    out_f32 = dynamic_lora_c_attn(x, base_weight, base_bias, a_vectors, b_vectors,
                                  alpha, compute_dtype=jnp.float32, fold_lora=False)
    out_f32 = jax.block_until_ready(out_f32)
    assert out_f32.shape == (B, T, out_dim)
    assert jnp.allclose(out_f32, ref, atol=1e-5, rtol=1e-5), "f32 mismatch vs reference"

    # f32-operand, folded-LoRA path (the v5e variant, exercised explicitly here).
    out_fold = dynamic_lora_c_attn(x, base_weight, base_bias, a_vectors, b_vectors,
                                   alpha, compute_dtype=jnp.float32, fold_lora=True)
    out_fold = jax.block_until_ready(out_fold)
    assert jnp.allclose(out_fold, ref, atol=1e-4, rtol=1e-4), "folded f32 mismatch"

    # Default path: bf16 operands (f32 accumulation), generation-auto tiling/fold.
    out_def = dynamic_lora_c_attn(x, base_weight, base_bias, a_vectors, b_vectors, alpha)
    out_def = jax.block_until_ready(out_def)
    assert jnp.allclose(out_def, ref, atol=5e-3, rtol=5e-2), "bf16 mismatch vs reference"

    # bf16 output variant (interface option for bf16 QKV downstream).
    out_bf16o = dynamic_lora_c_attn(x, base_weight, base_bias, a_vectors, b_vectors,
                                    alpha, out_dtype=jnp.bfloat16)
    out_bf16o = jax.block_until_ready(out_bf16o)
    assert jnp.allclose(out_bf16o.astype(jnp.float32), ref, atol=1e-2, rtol=5e-2), \
        "bf16-output mismatch vs reference"

    print("KERNEL_OK")
</pallas_src>

<mosaic_0001>
module attributes {stable_mosaic.version = 11 : i64} {
  func.func @_lora_cattn_kernel(%arg0: i32, %arg1: i32, %arg2: memref<16x32xf32, #tpu.memory_space<vmem>>, %arg3: memref<32x96xf32, #tpu.memory_space<vmem>>, %arg4: memref<1x96xf32, #tpu.memory_space<vmem>>, %arg5: memref<32x8xf32, #tpu.memory_space<vmem>>, %arg6: memref<8x96xf32, #tpu.memory_space<vmem>>, %arg7: memref<16x96xf32, #tpu.memory_space<vmem>>) attributes {dimension_semantics = [#tpu.dimension_semantics<parallel>, #tpu.dimension_semantics<parallel>], iteration_bounds = array<i64: 1, 1>, scalar_prefetch = 0 : i64, scratch_operands = 0 : i64, tpu.core_type = #tpu.core_type<tc>, window_params = [{transform_indices = @transform_0, window_bounds = array<i64: 16, 32>}, {pipeline_mode = #tpu.pipeline_mode<synchronous>, transform_indices = @transform_1, window_bounds = array<i64: 32, 96>}, {pipeline_mode = #tpu.pipeline_mode<synchronous>, transform_indices = @transform_2, window_bounds = array<i64: 1, 96>}, {pipeline_mode = #tpu.pipeline_mode<synchronous>, transform_indices = @transform_3, window_bounds = array<i64: 32, 8>}, {pipeline_mode = #tpu.pipeline_mode<synchronous>, transform_indices = @transform_4, window_bounds = array<i64: 8, 96>}, {transform_indices = @transform_5, window_bounds = array<i64: 16, 96>}]} {
    %c0 = arith.constant 0 : index
    %c0_0 = arith.constant 0 : index
    %0 = vector.load %arg2[%c0, %c0_0] : memref<16x32xf32, #tpu.memory_space<vmem>>, vector<16x32xf32>
    %c0_1 = arith.constant 0 : index
    %c0_2 = arith.constant 0 : index
    %1 = vector.load %arg5[%c0_1, %c0_2] : memref<32x8xf32, #tpu.memory_space<vmem>>, vector<32x8xf32>
    %cst = arith.constant dense<0.000000e+00> : vector<16x8xf32>
    %2 = tpu.matmul %0, %1, %cst {dimension_numbers = #tpu.dot_dimension_numbers<[1], [0], [0], [1], [0, 0, 1, 1], [], []>} : vector<16x32xf32>, vector<32x8xf32>, vector<16x8xf32> -> vector<16x8xf32>
    %c0_3 = arith.constant 0 : index
    %c0_4 = arith.constant 0 : index
    %3 = vector.load %arg6[%c0_3, %c0_4] : memref<8x96xf32, #tpu.memory_space<vmem>>, vector<8x96xf32>
    %cst_5 = arith.constant dense<0.000000e+00> : vector<16x96xf32>
    %4 = tpu.matmul %2, %3, %cst_5 {dimension_numbers = #tpu.dot_dimension_numbers<[1], [0], [0], [1], [0, 0, 1, 1], [], []>} : vector<16x8xf32>, vector<8x96xf32>, vector<16x96xf32> -> vector<16x96xf32>
    %c0_6 = arith.constant 0 : index
    %c0_7 = arith.constant 0 : index
    %5 = vector.load %arg4[%c0_6, %c0_7] : memref<1x96xf32, #tpu.memory_space<vmem>>, vector<1x96xf32>
    %6 = vector.broadcast %5 : vector<1x96xf32> to vector<16x96xf32>
    %7 = arith.addf %4, %6 : vector<16x96xf32>
    %c0_8 = arith.constant 0 : index
    %c0_9 = arith.constant 0 : index
    %8 = vector.load %arg3[%c0_8, %c0_9] : memref<32x96xf32, #tpu.memory_space<vmem>>, vector<32x96xf32>
    %cst_10 = arith.constant dense<0.000000e+00> : vector<16x96xf32>
    %9 = tpu.matmul %0, %8, %cst_10 {dimension_numbers = #tpu.dot_dimension_numbers<[1], [0], [0], [1], [0, 0, 1, 1], [], []>} : vector<16x32xf32>, vector<32x96xf32>, vector<16x96xf32> -> vector<16x96xf32>
    %10 = arith.addf %7, %9 : vector<16x96xf32>
    %c0_11 = arith.constant 0 : index
    %c0_12 = arith.constant 0 : index
    %11 = vector.load %arg7[%c0_11, %c0_12] : memref<16x96xf32, #tpu.memory_space<vmem>>, vector<16x96xf32>
    tpu.vector_store %arg7[%c0_11, %c0_12], %10 {strides = array<i32>} : memref<16x96xf32, #tpu.memory_space<vmem>>, vector<16x96xf32>,
    return
  }
  func.func @transform_0(%arg0: i32, %arg1: i32) -> (i32, i32) {
    %c0_i32 = arith.constant 0 : i32
    %c0_i32_0 = arith.constant 0 : i32
    return %arg1, %c0_i32 : i32, i32
  }
  func.func @transform_1(%arg0: i32, %arg1: i32) -> (i32, i32) {
    %c0_i32 = arith.constant 0 : i32
    %c0_i32_0 = arith.constant 0 : i32
    return %c0_i32, %arg0 : i32, i32
  }
  func.func @transform_2(%arg0: i32, %arg1: i32) -> (i32, i32) {
    %c0_i32 = arith.constant 0 : i32
    %c0_i32_0 = arith.constant 0 : i32
    return %c0_i32, %arg0 : i32, i32
  }
  func.func @transform_3(%arg0: i32, %arg1: i32) -> (i32, i32) {
    %c0_i32 = arith.constant 0 : i32
    %c0_i32_0 = arith.constant 0 : i32
    %c0_i32_1 = arith.constant 0 : i32
    return %c0_i32, %c0_i32_0 : i32, i32
  }
  func.func @transform_4(%arg0: i32, %arg1: i32) -> (i32, i32) {
    %c0_i32 = arith.constant 0 : i32
    %c0_i32_0 = arith.constant 0 : i32
    return %c0_i32, %arg0 : i32, i32
  }
  func.func @transform_5(%arg0: i32, %arg1: i32) -> (i32, i32) {
    %c0_i32 = arith.constant 0 : i32
    return %arg1, %arg0 : i32, i32
  }
}

</mosaic_0001>

<bundles_post_ra>
// kernel: tpu_custom_call.1
= control target key start
LH: loop header
LB: loop body
LE: loop exit
PB: predicated region body
PF: predicated region fallthrough
CT: control target
= control target key end

     0   :  { %10 = vsyncpa [#allocation3], 0  ;;  %s533_s0 = inlined_call_operand.hbm [shape: f32[16,32], index: 0, kind: input, shape index: {}]   ;;  %s534_s1 = inlined_call_operand.vmem [shape: f32[32,96], index: 1, kind: input, shape index: {}]   ;;  %s535_s2 = inlined_call_operand.vmem [shape: f32[1,96], index: 2, kind: input, shape index: {}]   ;;  %s536_s3 = inlined_call_operand.vmem [shape: f32[32,8], index: 3, kind: input, shape index: {}]   ;;  %s537_s4 = inlined_call_operand.vmem [shape: f32[8,96], index: 4, kind: input, shape index: {}]   ;;  %s538_s5 = inlined_call_operand.hbm [shape: f32[16,96], index: 5, kind: output, shape index: {}]  }
   0x1   :  { %11 = vsyncpa [#allocation4], 0  ;;  %s435_s18 = smov [#allocation2]   ;;  %s387_s22 = scalar_lea.hbm %s533_s0, 256 }
   0x2   :  { %s17_s19 = sshll.u32 %s435_s18, 4  ;;  %p388_p0 = scmp.ne.s32.totalorder %s533_s0, %s387_s22  ;;  %s18_s19 = int_to_ptr.vmem [resolvable:$true] %s17_s19 }
   0x3   :  { %p391_p1 = scmp.lt.u32.totalorder %s387_s22, %s533_s0 }
   0x5   :  { %p393_p2 = pnand %p391_p1, %p388_p0 }
   0x7   :  { %396 = shalt.err (!%p393_p2)
}
   0x8   :  { %s397_s27 = scalar_lea.vmem %s18_s19, 256  ;;  %p402_p4 = scmp.lt.s32.totalorder %s18_s19, %s18_s19 }
   0x9   :  { %p398_p3 = scmp.ne.s32.totalorder %s18_s19, %s397_s27  ;;  %p403_p5 = scmp.lt.s32.totalorder %s397_s27, %s397_s27 }
   0xb   :  { %p404_p6 = por %p403_p5, %p402_p4 }
   0xd   :  { %p405_p7 = pnand %p404_p6, %p398_p3 }
   0xf   :  { %408 = shalt.err (!%p405_p7)
}
  0x10   :  { %s436_s28 = smov 128   ;;  %s437_s29 = smov 8  }
  0x11   :  { %23 = dma.hbm_to_vmem [thread:$0]  %s533_s0, 256, %s18_s19, [#allocation3], %s436_s28, %s436_s28, %s437_s29  }
  0x12   :  { %431 = dma.done.wait [#allocation3], 256  }
  0x13   :  { %432 = vsyncadd [#allocation3], 4294967040  ;;  %vm41_vm0 = vcmask 261120   ;;  %v37_v0 = vld [vmem:[%s536_s3] sm:$0xff]  ;;  %v38_v1 = vld [vmem:[%s536_s3 + $0x8] sm:$0xff]  ;;  %vm131_vm1 = vcmask 64512  }
  0x14   :  { %v39_v2 = vld [vmem:[%s536_s3 + $0x10] sm:$0xff]  ;;  %v363_v3 = vpack.c.bf16 %v38_v1, %v37_v0  ;;  %v40_v4 = vld [vmem:[%s536_s3 + $0x18] sm:$0xff]  ;;  %v35_v5 = vld [vmem:[#allocation2] sm:$0xff]  ;;  %s438_s24 = smov [#allocation5]   ;;  %vm294_vm2 = vcmask 785408  }
  0x15   :  { %v367_v6 = vpack.c.bf16 %v40_v4, %v39_v2  ;;  %344 = vmatprep.mubr.msk.f32.mxu0 %vm41_vm0, %v35_v5  ;;  %v36_v7 = vld [vmem:[#allocation2 + $0x8] sm:$0xff]  ;;  %v123_v8 = vld [vmem:[%s537_s4] sm:$0xff]  ;;  %v215_v12 = vld [vmem:[%s534_s1 + $0x10] sm:$0xff]  ;;  %s302_s25 = sshll.u32 %s438_s24, 4  ;;  %s303_s25 = int_to_ptr.vmem [resolvable:$true] %s302_s25 }
  0x16   :  { %364 = vmatprep.subr.bf16.mxu0 %v363_v3  ;;  %v213_v9 = vld [vmem:[%s534_s1] sm:$0xff]  ;;  %v214_v10 = vld [vmem:[%s534_s1 + $0x8] sm:$0xff]  ;;  %347 = vmatprep.subr.mxu1 %v123_v8  ;;  %v216_v13 = vld [vmem:[%s534_s1 + $0x18] sm:$0xff]  ;;  %s409_s1 = scalar_lea.vmem %s303_s25, 256  ;;  %p414_p9 = scmp.lt.s32.totalorder %s303_s25, %s303_s25 }
  0x17   :  { %366 = vmatpush3.bf16.msra.mxu0 %v363_v3  ;;  %v371_v11 = vpack.c.bf16 %v214_v10, %v213_v9  ;;  %348 = vmatpush3.msra.mxu1 %v123_v8  ;;  %v375_v16 = vpack.c.bf16 %v216_v13, %v215_v12  ;;  %v316_v17 = vld [vmem:[%s535_s2] ss:$0 sm:$0xff]  ;;  %p410_p8 = scmp.ne.s32.totalorder %s303_s25, %s409_s1  ;;  %p415_p10 = scmp.lt.s32.totalorder %s409_s1, %s409_s1 }
  0x18   :  { %368 = vmatprep.subr.bf16.mxu0 %v367_v6 }
  0x19   :  { %372 = vmatprep.subr.bf16.mxu1 %v371_v11  ;;  %p416_p11 = por %p415_p10, %p414_p9 }
  0x1b   :  { %370 = vmatpush3.bf16.msra.mxu0 %v367_v6  ;;  %p417_p12 = pnand %p416_p11, %p410_p8 }
  0x1e   :  { %345 = vmatmul.mubr.msk.f32.vlgmr.msra.gmra.mrb[0].mxu0 %vm41_vm0, %v36_v7 }
  0xf1   :  { %v346_v14 = vpop.f32.mrb[0].mxu0 }
  0xf2   :  { %v114_v15 = vpop.f32.mrb[1].mxu0 }
  0xf3   :  { %349 = vmatprep.mubr.msk.f32.mxu1 %vm131_vm1, %v114_v15 }
  0xf4   :  { %350 = vmatmul.mubr.msk.f32.vlgmr.msra.gmra.mrb[0].mxu1 %vm131_vm1, %v346_v14 }
  0xf5   :  { %374 = vmatpush3.bf16.msra.mxu1 %v371_v11  ;;  %360 = vmatprep.mubr.msk.f32.mxu1 %vm41_vm0, %v35_v5 }
  0xf6   :  { %376 = vmatprep.subr.bf16.mxu1 %v375_v16 }
  0xf9   :  { %378 = vmatpush3.bf16.msra.mxu1 %v375_v16 }
  0xfc   :  { %361 = vmatmul.mubr.msk.f32.vlgmr.msra.gmra.mrb[0].mxu1 %vm41_vm0, %v36_v7 }
 0x1cf   :  { %v362_v18 = vpop.f32.mrb[0].mxu1 }
 0x1d0   :  { %v379_v19 = vadd.f32 %v362_v18, %v316_v17  ;;  %v283_v20 = vpop.f32.mrb[1].mxu1 }
 0x1d1   :  { %v380_v21 = vadd.f32 %v316_v17, %v283_v20 }
 0x1d2   :  { %296 = vst.msk [vmem:[#allocation5 + $0x8] sm:$0xff] %vm294_vm2, %v379_v19 }
 0x1d3   :  { %295 = vst.msk [vmem:[#allocation5] sm:$0xff] %vm294_vm2, %v380_v21 }
 0x1d4   :  { %420 = shalt.err (!%p417_p12)
}
 0x1d5   :  { %s421_s2 = scalar_lea.hbm %s538_s5, 256 }
 0x1d6   :  { %p422_p13 = scmp.ne.s32.totalorder %s538_s5, %s421_s2  ;;  %p425_p0 = scmp.lt.u32.totalorder %s421_s2, %s538_s5 }
 0x1d8   :  { %p427_p1 = pnand %p425_p0, %p422_p13 }
 0x1da   :  { %430 = shalt.err (!%p427_p1)
}
 0x1db   :  { %308 = dma.vmem_to_hbm [thread:$0]  %s303_s25, 256, %s538_s5, [#allocation4], %s436_s28, %s436_s28, %s437_s29  }
 0x1dc   :  { %433 = dma.done.wait [#allocation4], 256  }
 0x1dd   :  { %434 = vsyncadd [#allocation4], 4294967040 }
 0x1de   :  { %312 = vsyncpa [#allocation3], 1 }
 0x1df   :  { %313 = vsyncpa [#allocation4], 1 }

</bundles_post_ra>
